<compile_context>
chip_gen: v7x
topology: tpu7x:2x2x1
jax: 0.10.0
libtpu: 0.0.40
codegen_flags: <defaults>
</compile_context>

<pallas_src>
import functools

import jax
import jax.numpy as jnp
from jax import lax
from jax.experimental import pallas as pl
from jax.experimental.pallas import tpu as pltpu


def _round_up(x, m):
    return ((x + m - 1) // m) * m


def _pick_tile(dim, align, cap, ladder):
    """Pick a tile size for one dim.

    Prefer a single (align-rounded) block when it fits `cap`; otherwise pick
    the largest ladder entry whose padded extent is within 10% of the minimum
    achievable padded extent (so N=700 gets 256, not 1024).
    """
    full = dim if dim < align else _round_up(dim, align)
    if full <= cap:
        return full
    padded = [(t, _round_up(dim, t)) for t in ladder]   # ladder is descending
    best = min(p for _, p in padded)
    for t, p in padded:
        if p <= best * 1.10:
            return t
    return ladder[-1]


def _sigma_reparam_kernel(sigma_ref, x_ref, w_ref, b_ref, o_ref,
                          acc_ref, ss_ref, *, precision):
    """One (i, j, k) grid step of out = (x @ W^T) * sigma/(||W_row||+eps) + b."""
    k = pl.program_id(2)

    @pl.when(k == 0)
    def _init():
        acc_ref[...] = jnp.zeros_like(acc_ref)
        ss_ref[...] = jnp.zeros_like(ss_ref)

    w = w_ref[...]

    # (TM, TK) x (TN, TK), contracting K of both -> (TM, TN). No W.T relayout.
    acc_ref[...] += lax.dot_general(
        x_ref[...],
        w,
        dimension_numbers=(((1,), (1,)), ((), ())),
        preferred_element_type=jnp.float32,
        precision=precision,
    )

    # Fused per-row ||W||^2 for this K slab: ones(1,TK) @ (W*W)^T -> (1, TN).
    # Result lands lane-major so finalize is a pure sublane broadcast.
    ones_row = jnp.ones((1, w.shape[1]), w.dtype)
    ss_ref[...] += lax.dot_general(
        ones_row,
        w * w,
        dimension_numbers=(((1,), (1,)), ((), ())),
        preferred_element_type=jnp.float32,
    )

    @pl.when(k == pl.num_programs(2) - 1)
    def _finalize():
        # Row-scaling W by sigma/(||W_row||+eps) == column-scaling the output.
        scale = sigma_ref[0] / (jnp.sqrt(ss_ref[...]) + 1e-8)   # (1, TN)
        o_ref[...] = (acc_ref[...] * scale + b_ref[...]).astype(o_ref.dtype)


def sigma_reparam(x, weight, bias, sigma, *,
                  compute_dtype=jnp.bfloat16, precision=None):
    """x: (..., in_features); weight: (out, in); bias: (out,) or None; sigma: (1,).

    compute_dtype: dtype fed to the MXU (default bf16, f32 accumulation).
    precision:     lax.Precision for the main dot (only relevant for f32).
    """
    *lead, k_dim = x.shape
    n_dim, k_w = weight.shape
    assert k_w == k_dim, "in_features mismatch"

    m_dim = 1
    for d in lead:
        m_dim *= d
    m_dim = max(m_dim, 1)

    out_dtype = x.dtype
    if compute_dtype is None:
        compute_dtype = x.dtype
    compute_dtype = jnp.dtype(compute_dtype)

    # Per-generation VMEM budget: v7x has 64 MiB physical, v5e/v6e 128 MiB.
    try:
        vmem_cap = int(pltpu.get_tpu_info().vmem_capacity_bytes)
    except Exception:
        vmem_cap = 64 * 1024 * 1024
    vmem_limit = (96 if vmem_cap >= 100 * 1024 * 1024 else 48) * 1024 * 1024

    # Tile selection.  Caps keep the double-buffered footprint ~<= 30 MiB.
    k_cap = 2048 if compute_dtype.itemsize <= 2 else 1024
    ladder = (1024, 512, 256, 128)
    tm_ = _pick_tile(m_dim, 16, 1024, ladder)    # sublane axis (16 ok for bf16/f32)
    tn_ = _pick_tile(n_dim, 128, 1024, ladder)   # lane axis of the output
    tk_ = _pick_tile(k_dim, 128, k_cap, ladder)  # contraction (lane of x and W)
    k_pad = _round_up(k_dim, tk_)

    gm = pl.cdiv(m_dim, tm_)
    gn = pl.cdiv(n_dim, tn_)
    gk = k_pad // tk_

    # Cast once to the MXU dtype; zero-pad K only (M/N ragged blocks are
    # handled by the grid: OOB reads stay in discarded rows/cols).
    x2d = x.reshape(m_dim, k_dim).astype(compute_dtype)
    w2d = weight.astype(compute_dtype)
    if k_pad != k_dim:
        x2d = jnp.pad(x2d, ((0, 0), (0, k_pad - k_dim)))
        w2d = jnp.pad(w2d, ((0, 0), (0, k_pad - k_dim)))

    if bias is None:
        bias = jnp.zeros((n_dim,), jnp.float32)
    b2d = jnp.pad(bias.astype(jnp.float32).reshape(1, n_dim),
                  ((0, 0), (0, gn * tn_ - n_dim)))

    sigma32 = jnp.asarray(sigma, jnp.float32).reshape(-1)[:1]   # (1,) SMEM scalar

    # Lead with the parallel axis that has the most blocks so v7x's two
    # TensorCores both get work for decode-like (small-M) shapes.
    if gm >= gn:
        grid = (gm, gn, gk)
        x_map = lambda i, j, k, s: (i, k)
        w_map = lambda i, j, k, s: (j, k)
        b_map = lambda i, j, k, s: (0, j)
        o_map = lambda i, j, k, s: (i, j)
    else:
        grid = (gn, gm, gk)
        x_map = lambda j, i, k, s: (i, k)
        w_map = lambda j, i, k, s: (j, k)
        b_map = lambda j, i, k, s: (0, j)
        o_map = lambda j, i, k, s: (i, j)

    kernel = functools.partial(_sigma_reparam_kernel, precision=precision)

    out2d = pl.pallas_call(
        kernel,
        out_shape=jax.ShapeDtypeStruct((m_dim, n_dim), out_dtype),
        grid_spec=pltpu.PrefetchScalarGridSpec(
            num_scalar_prefetch=1,
            grid=grid,
            in_specs=[
                pl.BlockSpec((tm_, tk_), x_map),   # x tile
                pl.BlockSpec((tn_, tk_), w_map),   # W tile (raw, un-normalized)
                pl.BlockSpec((1, tn_), b_map),     # bias tile
            ],
            out_specs=pl.BlockSpec((tm_, tn_), o_map),
            scratch_shapes=[
                pltpu.VMEM((tm_, tn_), jnp.float32),   # f32 accumulator
                pltpu.VMEM((1, tn_), jnp.float32),     # per-column ||W_row||^2
            ],
        ),
        compiler_params=pltpu.CompilerParams(
            dimension_semantics=("parallel", "parallel", "arbitrary"),
            vmem_limit_bytes=vmem_limit,
        ),
    )(sigma32, x2d, w2d, b2d)

    return out2d.reshape(*lead, n_dim)


def _reference(x, weight, bias, sigma):
    w32 = weight.astype(jnp.float32)
    w_norm = w32 / (jnp.linalg.norm(w32, axis=1, keepdims=True) + 1e-8)
    w_scaled = w_norm * jnp.asarray(sigma, jnp.float32).reshape(-1)[0]
    out = jnp.einsum(
        "...k,nk->...n",
        x.astype(jnp.float32),
        w_scaled,
        precision=lax.Precision.HIGHEST,
    )
    if bias is not None:
        out = out + bias.astype(jnp.float32)
    return out


def _check(out, ref, atol=2e-2, rtol=2e-2):
    out32 = out.astype(jnp.float32)
    ok = jnp.allclose(out32, ref, atol=atol, rtol=rtol)
    assert bool(ok), float(jnp.max(jnp.abs(out32 - ref)))


if __name__ == "__main__":
    key = jax.random.PRNGKey(0)
    keys = jax.random.split(key, 9)

    # 1) Small shapes implied by the module: Linear(32 -> 32), x: (2, 8, 32).
    batch, seq, d_in, d_out = 2, 8, 32, 32
    x = jax.random.normal(keys[0], (batch, seq, d_in), dtype=jnp.float32)
    weight = jax.random.normal(keys[1], (d_out, d_in), dtype=jnp.float32) * 0.1
    bias = jax.random.normal(keys[2], (d_out,), dtype=jnp.float32) * 0.01
    sigma = jnp.ones((1,), dtype=jnp.float32)   # nn.Parameter(torch.ones(1))

    out = sigma_reparam(x, weight, bias, sigma)
    jax.block_until_ready(out)
    assert out.shape == (batch, seq, d_out)
    _check(out, _reference(x, weight, bias, sigma))

    # 2) Odd, non-aligned shapes: exercises K zero-padding (520->640), ragged
    #    partial blocks along M (1110 rows, tm=128) and N (700 cols, tn=768).
    b2, s2, d_in2, d_out2 = 3, 370, 520, 700
    x2 = jax.random.normal(keys[3], (b2, s2, d_in2), dtype=jnp.float32)
    w2 = jax.random.normal(keys[4], (d_out2, d_in2), dtype=jnp.float32) * 0.05
    bb2 = jax.random.normal(keys[5], (d_out2,), dtype=jnp.float32) * 0.01
    sigma2 = jnp.full((1,), 1.3, dtype=jnp.float32)

    out2 = sigma_reparam(x2, w2, bb2, sigma2)
    jax.block_until_ready(out2)
    assert out2.shape == (b2, s2, d_out2)
    _check(out2, _reference(x2, w2, bb2, sigma2))

    # 3) Decode-like shape (tiny M, wide N): exercises the N-leading grid,
    #    bias=None and bf16 inputs end-to-end.
    b3, s3, d_in3, d_out3 = 1, 4, 256, 3000
    x3 = jax.random.normal(keys[6], (b3, s3, d_in3), dtype=jnp.bfloat16)
    w3 = (jax.random.normal(keys[7], (d_out3, d_in3), dtype=jnp.float32)
          * 0.02).astype(jnp.bfloat16)
    sigma3 = jnp.full((1,), 0.7, dtype=jnp.float32)

    out3 = sigma_reparam(x3, w3, None, sigma3)
    jax.block_until_ready(out3)
    assert out3.shape == (b3, s3, d_out3)
    _check(out3, _reference(x3, w3, None, sigma3))

    print("KERNEL_OK")
</pallas_src>

<mosaic_0001>
module attributes {stable_mosaic.version = 11 : i64} {
  func.func @_sigma_reparam_kernel(%arg0: i32, %arg1: i32, %arg2: i32, %arg3: memref<1xf32, #tpu.memory_space<smem>>, %arg4: memref<16x32xbf16, #tpu.memory_space<vmem>>, %arg5: memref<32x32xbf16, #tpu.memory_space<vmem>>, %arg6: memref<1x32xf32, #tpu.memory_space<vmem>>, %arg7: memref<16x32xf32, #tpu.memory_space<vmem>>, %arg8: memref<16x32xf32, #tpu.memory_space<vmem>>, %arg9: memref<1x32xf32, #tpu.memory_space<vmem>>) attributes {dimension_semantics = [#tpu.dimension_semantics<parallel>, #tpu.dimension_semantics<parallel>, #tpu.dimension_semantics<arbitrary>], iteration_bounds = array<i64: 1, 1, 1>, scalar_prefetch = 1 : i64, scratch_operands = 2 : i64, tpu.core_type = #tpu.core_type<tc>, window_params = [{transform_indices = @transform_0, window_bounds = array<i64: 16, 32>}, {transform_indices = @transform_1, window_bounds = array<i64: 32, 32>}, {transform_indices = @transform_2, window_bounds = array<i64: 1, 32>}, {transform_indices = @transform_3, window_bounds = array<i64: 16, 32>}]} {
    %c0_i32 = arith.constant 0 : i32
    %0 = arith.cmpi eq, %arg2, %c0_i32 : i32
    %1 = arith.extui %0 : i1 to i32
    %c0_i32_0 = arith.constant 0 : i32
    %2 = arith.cmpi ne, %1, %c0_i32_0 : i32
    scf.if %2 {
      %cst_16 = arith.constant 0.000000e+00 : f32
      %18 = vector.broadcast %cst_16 : f32 to vector<16x32xf32>
      %c0_17 = arith.constant 0 : index
      %c0_18 = arith.constant 0 : index
      %19 = vector.load %arg8[%c0_17, %c0_18] : memref<16x32xf32, #tpu.memory_space<vmem>>, vector<16x32xf32>
      tpu.vector_store %arg8[%c0_17, %c0_18], %18 {strides = array<i32>} : memref<16x32xf32, #tpu.memory_space<vmem>>, vector<16x32xf32>,
      %cst_19 = arith.constant 0.000000e+00 : f32
      %20 = vector.broadcast %cst_19 : f32 to vector<1x32xf32>
      %c0_20 = arith.constant 0 : index
      %c0_21 = arith.constant 0 : index
      %21 = vector.load %arg9[%c0_20, %c0_21] : memref<1x32xf32, #tpu.memory_space<vmem>>, vector<1x32xf32>
      tpu.vector_store %arg9[%c0_20, %c0_21], %20 {strides = array<i32>} : memref<1x32xf32, #tpu.memory_space<vmem>>, vector<1x32xf32>,
    } else {
    }
    %c0 = arith.constant 0 : index
    %c0_1 = arith.constant 0 : index
    %3 = vector.load %arg5[%c0, %c0_1] : memref<32x32xbf16, #tpu.memory_space<vmem>>, vector<32x32xbf16>
    %c0_2 = arith.constant 0 : index
    %c0_3 = arith.constant 0 : index
    %4 = vector.load %arg8[%c0_2, %c0_3] : memref<16x32xf32, #tpu.memory_space<vmem>>, vector<16x32xf32>
    %c0_4 = arith.constant 0 : index
    %c0_5 = arith.constant 0 : index
    %5 = vector.load %arg4[%c0_4, %c0_5] : memref<16x32xbf16, #tpu.memory_space<vmem>>, vector<16x32xbf16>
    %cst = arith.constant dense<0.000000e+00> : vector<16x32xf32>
    %6 = tpu.matmul %5, %3, %cst {dimension_numbers = #tpu.dot_dimension_numbers<[1], [1], [0], [0], [0, 0, 1, 0], [], []>} : vector<16x32xbf16>, vector<32x32xbf16>, vector<16x32xf32> -> vector<16x32xf32>
    %7 = arith.addf %4, %6 : vector<16x32xf32>
    %c0_6 = arith.constant 0 : index
    %c0_7 = arith.constant 0 : index
    %8 = vector.load %arg8[%c0_6, %c0_7] : memref<16x32xf32, #tpu.memory_space<vmem>>, vector<16x32xf32>
    tpu.vector_store %arg8[%c0_6, %c0_7], %7 {strides = array<i32>} : memref<16x32xf32, #tpu.memory_space<vmem>>, vector<16x32xf32>,
    %cst_8 = arith.constant 1.000000e+00 : bf16
    %9 = vector.broadcast %cst_8 : bf16 to vector<1x32xbf16>
    %c0_9 = arith.constant 0 : index
    %c0_10 = arith.constant 0 : index
    %10 = vector.load %arg9[%c0_9, %c0_10] : memref<1x32xf32, #tpu.memory_space<vmem>>, vector<1x32xf32>
    %11 = arith.mulf %3, %3 : vector<32x32xbf16>
    %cst_11 = arith.constant dense<0.000000e+00> : vector<1x32xf32>
    %12 = tpu.matmul %9, %11, %cst_11 {dimension_numbers = #tpu.dot_dimension_numbers<[1], [1], [0], [0], [0, 0, 1, 0], [], []>} : vector<1x32xbf16>, vector<32x32xbf16>, vector<1x32xf32> -> vector<1x32xf32>
    %13 = arith.addf %10, %12 : vector<1x32xf32>
    %c0_12 = arith.constant 0 : index
    %c0_13 = arith.constant 0 : index
    %14 = vector.load %arg9[%c0_12, %c0_13] : memref<1x32xf32, #tpu.memory_space<vmem>>, vector<1x32xf32>
    tpu.vector_store %arg9[%c0_12, %c0_13], %13 {strides = array<i32>} : memref<1x32xf32, #tpu.memory_space<vmem>>, vector<1x32xf32>,
    %c0_i32_14 = arith.constant 0 : i32
    %15 = arith.cmpi eq, %arg2, %c0_i32_14 : i32
    %16 = arith.extui %15 : i1 to i32
    %c0_i32_15 = arith.constant 0 : i32
    %17 = arith.cmpi ne, %16, %c0_i32_15 : i32
    scf.if %17 {
      %c0_16 = arith.constant 0 : index
      %18 = memref.load %arg3[%c0_16] : memref<1xf32, #tpu.memory_space<smem>>
      %c0_17 = arith.constant 0 : index
      %c0_18 = arith.constant 0 : index
      %19 = vector.load %arg9[%c0_17, %c0_18] : memref<1x32xf32, #tpu.memory_space<vmem>>, vector<1x32xf32>
      %20 = math.sqrt %19 : vector<1x32xf32>
      %cst_19 = arith.constant 9.99999993E-9 : f32
      %21 = vector.broadcast %cst_19 : f32 to vector<1x32xf32>
      %22 = arith.addf %20, %21 : vector<1x32xf32>
      %23 = vector.broadcast %18 : f32 to vector<1x32xf32>
      %24 = arith.divf %23, %22 : vector<1x32xf32>
      %c0_20 = arith.constant 0 : index
      %c0_21 = arith.constant 0 : index
      %25 = vector.load %arg8[%c0_20, %c0_21] : memref<16x32xf32, #tpu.memory_space<vmem>>, vector<16x32xf32>
      %26 = vector.broadcast %24 : vector<1x32xf32> to vector<16x32xf32>
      %27 = arith.mulf %25, %26 : vector<16x32xf32>
      %c0_22 = arith.constant 0 : index
      %c0_23 = arith.constant 0 : index
      %28 = vector.load %arg6[%c0_22, %c0_23] : memref<1x32xf32, #tpu.memory_space<vmem>>, vector<1x32xf32>
      %29 = vector.broadcast %28 : vector<1x32xf32> to vector<16x32xf32>
      %30 = arith.addf %27, %29 : vector<16x32xf32>
      %c0_24 = arith.constant 0 : index
      %c0_25 = arith.constant 0 : index
      %31 = vector.load %arg7[%c0_24, %c0_25] : memref<16x32xf32, #tpu.memory_space<vmem>>, vector<16x32xf32>
      tpu.vector_store %arg7[%c0_24, %c0_25], %30 {strides = array<i32>} : memref<16x32xf32, #tpu.memory_space<vmem>>, vector<16x32xf32>,
    } else {
    }
    return
  }
  func.func @transform_0(%arg0: i32, %arg1: i32, %arg2: i32, %arg3: memref<1xf32, #tpu.memory_space<smem>>) -> (i32, i32) {
    %c0_i32 = arith.constant 0 : i32
    return %arg0, %arg2 : i32, i32
  }
  func.func @transform_1(%arg0: i32, %arg1: i32, %arg2: i32, %arg3: memref<1xf32, #tpu.memory_space<smem>>) -> (i32, i32) {
    %c0_i32 = arith.constant 0 : i32
    return %arg1, %arg2 : i32, i32
  }
  func.func @transform_2(%arg0: i32, %arg1: i32, %arg2: i32, %arg3: memref<1xf32, #tpu.memory_space<smem>>) -> (i32, i32) {
    %c0_i32 = arith.constant 0 : i32
    %c0_i32_0 = arith.constant 0 : i32
    return %c0_i32, %arg1 : i32, i32
  }
  func.func @transform_3(%arg0: i32, %arg1: i32, %arg2: i32, %arg3: memref<1xf32, #tpu.memory_space<smem>>) -> (i32, i32) {
    %c0_i32 = arith.constant 0 : i32
    return %arg0, %arg1 : i32, i32
  }
}

</mosaic_0001>

<bundles_post_ra>
// kernel: tpu_custom_call.1
= control target key start
LH: loop header
LB: loop body
LE: loop exit
PB: predicated region body
PF: predicated region fallthrough
CT: control target
= control target key end

     0   :  { %10 = vsyncpa [#allocation7], 0  ;;  %s465_s0 = inlined_call_operand.<no memory space> [shape: f32[1], index: 0, kind: input, shape index: {}]   ;;  %s466_s1 = inlined_call_operand.hbm [shape: bf16[16,32], index: 1, kind: input, shape index: {}]   ;;  %s467_s2 = inlined_call_operand.hbm [shape: bf16[32,32], index: 2, kind: input, shape index: {}]   ;;  %s468_s3 = inlined_call_operand.vmem [shape: f32[1,32], index: 3, kind: input, shape index: {}]   ;;  %s469_s4 = inlined_call_operand.hbm [shape: f32[16,32], index: 4, kind: output, shape index: {}]  }
   0x1   :  { %11 = vsyncpa [#allocation10], 0 }
   0x2   :  { %12 = vsyncpa [#allocation8], 0  ;;  %s374_s15 = smov [#allocation6]   ;;  %s302_s19 = scalar_lea.hbm %s466_s1, 128 }
   0x3   :  { %s18_s16 = sshll.u32 %s374_s15, 4  ;;  %p303_p0 = scmp.ne.s32.totalorder %s466_s1, %s302_s19  ;;  %s19_s16 = int_to_ptr.vmem [resolvable:$true] %s18_s16 }
   0x4   :  { %p306_p1 = scmp.lt.u32.totalorder %s302_s19, %s466_s1 }
   0x6   :  { %p308_p2 = pnand %p306_p1, %p303_p0 }
   0x8   :  { %311 = shalt.err (!%p308_p2)
}
   0x9   :  { %s312_s24 = scalar_lea.vmem %s19_s16, 128  ;;  %p317_p4 = scmp.lt.s32.totalorder %s19_s16, %s19_s16 }
   0xa   :  { %p313_p3 = scmp.ne.s32.totalorder %s19_s16, %s312_s24  ;;  %p318_p5 = scmp.lt.s32.totalorder %s312_s24, %s312_s24 }
   0xc   :  { %p319_p6 = por %p318_p5, %p317_p4 }
   0xe   :  { %p320_p7 = pnand %p319_p6, %p313_p3 }
  0x10   :  { %323 = shalt.err (!%p320_p7)
}
  0x11   :  { %s375_s25 = smov 64   ;;  %s376_s26 = smov 4  }
  0x12   :  { %24 = dma.hbm_to_vmem [thread:$0]  %s466_s1, 128, %s19_s16, [#allocation7], %s375_s25, %s375_s25, %s376_s26  }
  0x13   :  { %s377_s29 = smov [#allocation9]   ;;  %s324_s7 = scalar_lea.hbm %s467_s2, 256 }
  0x14   :  { %s30_s30 = sshll.u32 %s377_s29, 4  ;;  %p325_p8 = scmp.ne.s32.totalorder %s467_s2, %s324_s7  ;;  %s31_s30 = int_to_ptr.vmem [resolvable:$true] %s30_s30 }
  0x15   :  { %p328_p9 = scmp.lt.u32.totalorder %s324_s7, %s467_s2 }
  0x17   :  { %p330_p10 = pnand %p328_p9, %p325_p8 }
  0x19   :  { %333 = shalt.err (!%p330_p10)
}
  0x1a   :  { %s334_s12 = scalar_lea.vmem %s31_s30, 256  ;;  %p339_p12 = scmp.lt.s32.totalorder %s31_s30, %s31_s30 }
  0x1b   :  { %p335_p11 = scmp.ne.s32.totalorder %s31_s30, %s334_s12  ;;  %p340_p13 = scmp.lt.s32.totalorder %s334_s12, %s334_s12 }
  0x1d   :  { %p341_p0 = por %p340_p13, %p339_p12 }
  0x1f   :  { %p342_p1 = pnand %p341_p0, %p335_p11 }
  0x21   :  { %345 = shalt.err (!%p342_p1)
}
  0x22   :  { %36 = dma.hbm_to_vmem [thread:$0]  %s467_s2, 256, %s31_s30, [#allocation10], %s375_s25, %s375_s25, %s376_s26  }
  0x23   :  { %368 = dma.done.wait [#allocation7], 128  }
  0x24   :  { %369 = vsyncadd [#allocation7], 4294967168 }
  0x25   :  { %370 = dma.done.wait [#allocation10], 256  }
  0x26   :  { %371 = vsyncadd [#allocation10], 4294967040  ;;  %vm51_vm0 = vcmask 261120   ;;  %vm54_vm1 = vcmask 253952   ;;  %v378_v0 = vmov 0.0   ;;  %vm379_vm2 = vmmov 0  }
  0x27   :  { %278 = vmatprep.subr.bf16.mxu1 %v378_v0  ;;  %52 = vst.msk [vmem:[#allocation2] sm:$0xff] %vm51_vm0, %v378_v0  ;;  %53 = vst.msk [vmem:[#allocation2 + $0x8] sm:$0xff] %vm51_vm0, %v378_v0  ;;  %282 = vmatprep.mubr.msk.bf16.mxu1 %vm379_vm2, %v378_v0  ;;  %v56_v1 = vld [vmem:[#allocation9] sm:$0xf]  ;;  %v57_v2 = vld [vmem:[#allocation9 + $0x4] sm:$0xf]  ;;  %v220_v40 = vlaneseq  ;;  %v214_v42 = vstv %s465_s0 }
  0x28   :  { %55 = vst.msk [vmem:[#allocation3] sm:$0x1] %vm54_vm1, %v378_v0  ;;  %270 = vmatprep.subr.bf16.mxu0 %v378_v0  ;;  %274 = vmatprep.mubr.msk.bf16.mxu0 %vm379_vm2, %v378_v0  ;;  %v58_v3 = vld [vmem:[#allocation9 + $0x8] sm:$0xf]  ;;  %v135_v4 = vmul.bf16 %v56_v1, %v56_v1  ;;  %v136_v5 = vmul.bf16 %v57_v2, %v57_v2  ;;  %v59_v6 = vld [vmem:[#allocation9 + $0xc] sm:$0xf] }
  0x29   :  { %v257_v7 = vcombine.low %v56_v1, %v57_v2  ;;  %v137_v9 = vmul.bf16 %v58_v3, %v58_v3  ;;  %v138_v10 = vmul.bf16 %v59_v6, %v59_v6  ;;  %v258_v13 = vcombine.low %v58_v3, %v59_v6  ;;  %v297_v17 = vld [vmem:[#allocation6] sm:$0xff]   ;;  %s381_s15 = smov [#allocation11]   ;;  %v263_v49 = vld [vmem:[%s468_s3] ss:$0 sm:$0xff] }
  0x2a   :  { %v260_v8 = vcombine.low %v135_v4, %v136_v5  ;;  %v380_v18 = vmov 1065369472   ;;  %v221_v41 = vshrl.u32 %v220_v40, 7  ;;  %s243_s16 = sshll.u32 %s381_s15, 4  ;;  %s244_s16 = int_to_ptr.vmem [resolvable:$true] %s243_s16 }
  0x2b   :  { %v84_v11 = vsel %vm51_vm0, %v257_v7, 0  ;;  %v261_v14 = vcombine.low %v137_v9, %v138_v10  ;;  %v87_v15 = vsel %vm51_vm0, %v258_v13, 0  ;;  %s346_s0 = scalar_lea.vmem %s244_s16, 256  ;;  %p351_p3 = scmp.lt.s32.totalorder %s244_s16, %s244_s16 }
  0x2c   :  { %271 = vmatpush3.bf16.xpose.msra.mxu0 %v84_v11  ;;  %v153_v12 = vsel %vm51_vm0, %v260_v8, 0  ;;  %v222_v43 = vsub.s32 0, %v221_v41  ;;  %p347_p2 = scmp.ne.s32.totalorder %s244_s16, %s346_s0  ;;  %p352_p4 = scmp.lt.s32.totalorder %s346_s0, %s346_s0 }
  0x2d   :  { %272 = vmatprep.subr.bf16.mxu0 %v378_v0  ;;  %279 = vmatpush3.bf16.xpose.msra.mxu1 %v153_v12  ;;  %v156_v16 = vsel %vm51_vm0, %v261_v14, 0 }
  0x2e   :  { %280 = vmatprep.subr.bf16.mxu1 %v378_v0  ;;  %v60_v19 = vld [vmem:[#allocation2] sm:$0xff]  ;;  %v61_v22 = vld [vmem:[#allocation2 + $0x8] sm:$0xff]  ;;  %p353_p5 = por %p352_p4, %p351_p3 }
  0x2f   :  { %v134_v20 = vld [vmem:[#allocation3] sm:$0x1] }
  0x30   :  { %p354_p6 = pnand %p353_p5, %p347_p2 }
  0x34   :  { %273 = vmatpush3.bf16.xpose.msra.mxu0 %v87_v15 }
  0x35   :  { %281 = vmatpush3.bf16.xpose.msra.mxu1 %v156_v16 }
  0x3b   :  { %275 = vmatmul.mubr.msk.bf16.vlgmr.msra.gmra.mrb[0].mxu0 %vm51_vm0, %v297_v17 }
  0x3c   :  { %283 = vmatmul.mubr.msk.bf16.vlgmr.msra.gmra.mrb[0].mxu1 %vm51_vm0, %v380_v18 }
 0x10e   :  { %v123_v21 = vpop.f32.mrb[0].mxu0 }
 0x10f   :  { %v130_v23 = vadd.f32 %v123_v21, %v60_v19  ;;  %v276_v24 = vpop.f32.mrb[1].mxu0  ;;  %v192_v25 = vpop.f32.mrb[0].mxu1 }
 0x110   :  { %v126_v26 = vpop.f32.mrb[2].mxu0  ;;  %v198_v27 = vadd.f32 %v192_v25, %v134_v20  ;;  %v284_v28 = vpop.f32.mrb[1].mxu1 }
 0x111   :  { %132 = vst.msk [vmem:[#allocation2] sm:$0xff] %vm51_vm0, %v130_v23  ;;  %v131_v29 = vadd.f32 %v126_v26, %v61_v22  ;;  %v277_v30 = vpop.f32.mrb[3].mxu0  ;;  %v195_v31 = vpop.f32.mrb[2].mxu1 }
 0x112   :  { %200 = vst.msk [vmem:[#allocation3] sm:$0x1] %vm54_vm1, %v198_v27  ;;  %v285_v32 = vpop.f32.mrb[3].mxu1 }
 0x113   :  { %133 = vst.msk [vmem:[#allocation2 + $0x8] sm:$0xff] %vm51_vm0, %v131_v29 }
 0x118   :  { %v217_v47 = vld [vmem:[#allocation2] sm:$0xff] }
 0x119   :  { %v205_v33 = vld [vmem:[#allocation3] sm:$0x1] }
 0x11a   :  { %298 = vrsqrt.f32 %v205_v33  ;;  %vm208_vm3 = vcmp.eq.f32.partialorder %v205_v33, inf  ;;  %v211_v36 = vand.u32 2147483648, %v205_v33  ;;  %vm210_vm4 = vcmp.eq.f32.partialorder %v205_v33, 0.0  ;;  %v218_v48 = vld [vmem:[#allocation2 + $0x8] sm:$0xff] }
 0x124   :  { %v299_v34 = vpop.eup %298 }
 0x125   :  { %v207_v35 = vmul.f32 %v299_v34, %v205_v33 }
 0x127   :  { %v209_v37 = vsel %vm208_vm3, %v205_v33, %v207_v35 }
 0x128   :  { %v212_v38 = vsel %vm210_vm4, %v211_v36, %v209_v37 }
 0x129   :  { %v213_v39 = vadd.f32 1e-08, %v212_v38 }
 0x12b   :  { %300 = vrcp.f32 %v213_v39 }
 0x135   :  { %v301_v44 = vpop.eup %300 }
 0x136   :  { %v216_v45 = vmul.f32 %v301_v44, %v214_v42 }
 0x138   :  { %v223_v46 = vrot.slane %v216_v45, %v222_v43 }
 0x13a   :  { %v225_v50 = vmul.f32 %v223_v46, %v217_v47  ;;  %v226_v51 = vmul.f32 %v223_v46, %v218_v48 }
 0x13c   :  { %v234_v52 = vadd.f32 %v263_v49, %v225_v50  ;;  %v235_v53 = vadd.f32 %v263_v49, %v226_v51 }
 0x13e   :  { %236 = vst.msk [vmem:[#allocation11] sm:$0xff] %vm51_vm0, %v234_v52  ;;  %237 = vst.msk [vmem:[#allocation11 + $0x8] sm:$0xff] %vm51_vm0, %v235_v53 }
 0x13f   :  { %357 = shalt.err (!%p354_p6)
}
 0x140   :  { %s358_s3 = scalar_lea.hbm %s469_s4, 256 }
 0x141   :  { %p359_p7 = scmp.ne.s32.totalorder %s469_s4, %s358_s3  ;;  %p362_p8 = scmp.lt.u32.totalorder %s358_s3, %s469_s4 }
 0x143   :  { %p364_p9 = pnand %p362_p8, %p359_p7 }
 0x145   :  { %367 = shalt.err (!%p364_p9)
}
 0x146   :  { %s382_s25 = smov 128   ;;  %s383_s26 = smov 8  }
 0x147   :  { %249 = dma.vmem_to_hbm [thread:$0]  %s244_s16, 256, %s469_s4, [#allocation8], %s382_s25, %s382_s25, %s383_s26  }
 0x148   :  { %372 = dma.done.wait [#allocation8], 256  }
 0x149   :  { %373 = vsyncadd [#allocation8], 4294967040 }
 0x14a   :  { %253 = vsyncpa [#allocation7], 1 }
 0x14b   :  { %254 = vsyncpa [#allocation10], 1 }
 0x14c   :  { %255 = vsyncpa [#allocation8], 1 }

</bundles_post_ra>
